<compile_context>
chip_gen: v7x
topology: tpu7x:2x2x1
jax: 0.10.0
libtpu: 0.0.40
codegen_flags: <defaults>
</compile_context>

<pallas_src>
import functools

import jax
import jax.numpy as jnp
import numpy as np
from jax import lax
from jax.experimental import pallas as pl
from jax.experimental.pallas import tpu as pltpu

NUM_CLASSES = 8
FOCAL_ALPHA = 0.25
FOCAL_GAMMA = 2.0          # compile-time constant: gamma == 2 -> explicit square
_LANES = 128


def _cdiv(a, b):
    return -(-a // b)


# ----------------------------------------------------------------------------
# Kernel 1: negatives-only sigmoid focal loss (sum reduction), lane-dense.
# ----------------------------------------------------------------------------
def _focal_neg_kernel(x_ref, out_ref, *, alpha, tile_m, total, need_mask):
    """Sum of sigmoid-focal loss assuming EVERY element is a negative.

    For gamma == 2 the negatives-only focal term is
        (1 - alpha) * softplus(x) * sigmoid(x)^2
    with sigmoid(x)^2 = exp(2*(x - softplus(x))): 3 EUP transcendentals
    (exp, log, exp), no divide, no select, no one-hot compare -> the
    saturating VALU slot stays light.  The per-positive correction is added
    by the positive-set kernel.
    """
    x = x_ref[...]

    if need_mask:
        # Ragged tail: mask (a) zero-padded elements of the last real row and
        # (b) garbage rows of a partial last block.  Row-level compare avoids
        # any int32 flat-index overflow.
        full_rows, rem = divmod(total, _LANES)
        r = lax.broadcasted_iota(jnp.int32, x.shape, 0)
        row_g = pl.program_id(0) * tile_m + r
        if rem == 0:
            valid = row_g < full_rows
        else:
            l = lax.broadcasted_iota(jnp.int32, x.shape, 1)
            valid = (row_g < full_rows) | ((row_g == full_rows) & (l < rem))
        x = jnp.where(valid, x, 0.0)            # keep garbage out of exp()

    e = jnp.exp(-jnp.abs(x))                    # EUP
    sp = jnp.maximum(x, 0.0) + jnp.log(1.0 + e)  # softplus(x), EUP log
    p2 = jnp.exp(2.0 * (x - sp))                # sigmoid(x)^2, EUP
    loss = ((1.0 - alpha) * sp) * p2

    if need_mask:
        loss = jnp.where(valid, loss, 0.0)      # pad elements contribute 0

    # Per-tile partial sum: [tile_m,128] -> [8,128] with VALU adds only; each
    # grid step owns its own lane-dense output block (parallel-safe).
    out_ref[...] = jnp.sum(loss.reshape(tile_m // 8, 8, _LANES), axis=0)


def _pick_tiling(rows, max_tile_m=2048, min_grid=4):
    """Multiple-of-8 row tile aiming for >= min_grid grid steps.

    >= 4 steps lets BlockSpec double-buffering overlap DMA with compute and
    gives both v7x TensorCores work; the tile is capped at 2048x128 f32
    (~1 MiB/step, far under the scoped VMEM limit on every generation).
    """
    if rows <= 8 * min_grid:
        tile_m = 8
    else:
        tile_m = min(max_tile_m, max(8, (rows // min_grid) // 8 * 8))
    return tile_m, _cdiv(rows, tile_m)


def focal_neg_loss_sum(x_flat, *, alpha=FOCAL_ALPHA, max_tile_m=2048,
                       min_grid=4):
    """Sum over all logits of the negatives-only sigmoid focal loss.

    x_flat: [total] float32 logits (location-major, class-minor).
    """
    total = int(x_flat.shape[0])
    rows = max(8, _cdiv(total, _LANES))
    pad = rows * _LANES - total
    if pad:
        # TODO(synk): only hit when N*C is not a multiple of 128 (rare with
        # C=8); the common case feeds the kernel with no extra XLA pad copy.
        x_flat = jnp.pad(x_flat, (0, pad))
    x2d = x_flat.reshape(rows, _LANES)

    tile_m, grid = _pick_tiling(rows, max_tile_m, min_grid)
    need_mask = grid * tile_m * _LANES != total

    kernel = functools.partial(_focal_neg_kernel, alpha=alpha, tile_m=tile_m,
                               total=total, need_mask=need_mask)
    partials = pl.pallas_call(
        kernel,
        out_shape=jax.ShapeDtypeStruct((grid * 8, _LANES), jnp.float32),
        grid=(grid,),
        in_specs=[pl.BlockSpec((tile_m, _LANES), lambda i: (i, 0))],
        out_specs=pl.BlockSpec((8, _LANES), lambda i: (i, 0)),
        compiler_params=pltpu.CompilerParams(
            dimension_semantics=("parallel",)),
        cost_estimate=pl.CostEstimate(
            flops=14 * grid * tile_m * _LANES,
            transcendentals=3 * grid * tile_m * _LANES,
            bytes_accessed=rows * _LANES * 4 + grid * 8 * _LANES * 4),
    )(x2d)
    # Tiny cross-tile reduce in XLA.
    return jnp.sum(partials)


# ----------------------------------------------------------------------------
# Kernel 2: positive-set losses (centerness targets, GIoU, BCE centerness)
# plus the focal-loss positive correction.  Channels-first [C, P_pad] layout
# so the P axis sits on lanes; the four scalar sums are packed into a single
# lane-dense (1, 128) output.
# ----------------------------------------------------------------------------
def _pos_kernel(pred_ref, tgt_ref, ctrp_ref, poscls_ref, mask_ref,
                ctr_tgt_ref, sums_ref, *, alpha):
    pred = pred_ref[...]      # [4, Pp]
    tgt = tgt_ref[...]        # [4, Pp]
    mask = mask_ref[...]      # [1, Pp]

    tl, tt, tr, tb = tgt[0:1], tgt[1:2], tgt[2:3], tgt[3:4]

    # centerness targets: sqrt(min(l,r)/max(l,r) * min(t,b)/max(t,b))
    lr_min = jnp.minimum(tl, tr)
    lr_max = jnp.maximum(tl, tr)
    tb_min = jnp.minimum(tt, tb)
    tb_max = jnp.maximum(tt, tb)
    lr_den = jnp.where(mask > 0, lr_max, 1.0)
    tb_den = jnp.where(mask > 0, tb_max, 1.0)
    ctr = jnp.sqrt((lr_min / lr_den) * (tb_min / tb_den)) * mask   # [1, Pp]
    ctr_tgt_ref[...] = ctr
    ctr_sum = jnp.sum(ctr, axis=1, keepdims=True)                  # [1, 1]

    # GIoU loss weighted by centerness targets (sum-reduced)
    p_l, p_t, p_r, p_b = pred[0:1], pred[1:2], pred[2:3], pred[3:4]
    target_area = (tl + tr) * (tt + tb)
    pred_area = (p_l + p_r) * (p_t + p_b)
    w_int = jnp.minimum(p_l, tl) + jnp.minimum(p_r, tr)
    g_w_int = jnp.maximum(p_l, tl) + jnp.maximum(p_r, tr)
    h_int = jnp.minimum(p_b, tb) + jnp.minimum(p_t, tt)
    g_h_int = jnp.maximum(p_b, tb) + jnp.maximum(p_t, tt)
    ac_union = g_w_int * g_h_int + 1e-7
    area_int = w_int * h_int
    area_union = target_area + pred_area - area_int
    ious = (area_int + 1.0) / (area_union + 1.0)
    gious = ious - (ac_union - area_union) / ac_union
    giou_sum = jnp.sum((1.0 - gious) * ctr, axis=1, keepdims=True)

    # BCE-with-logits centerness loss (sum-reduced)
    x = ctrp_ref[...]         # [1, Pp]
    e = jnp.exp(-jnp.abs(x))
    bce = jnp.maximum(x, 0.0) - x * ctr + jnp.log(1.0 + e)
    bce_sum = jnp.sum(bce * mask, axis=1, keepdims=True)

    # Focal-loss positive correction: the big kernel treated every logit as a
    # negative; add  alpha*softplus(-x)*(1-p)^2 - (1-alpha)*softplus(x)*p^2
    # at the P positive (location, gt-class) logits.
    xk = poscls_ref[...]      # [1, Pp]
    ek = jnp.exp(-jnp.abs(xk))
    sp_neg = jnp.maximum(xk, 0.0) + jnp.log(1.0 + ek)   # softplus(x)
    sp_pos = sp_neg - xk                                 # softplus(-x)
    p2 = jnp.exp(-2.0 * sp_pos)                          # sigmoid(x)^2
    q2 = jnp.exp(-2.0 * sp_neg)                          # (1 - sigmoid(x))^2
    corr = alpha * sp_pos * q2 - (1.0 - alpha) * sp_neg * p2
    corr_sum = jnp.sum(corr * mask, axis=1, keepdims=True)

    # Pack the four scalar sums into one lane-dense (1, 128) store:
    #   lane 0: sum(centerness targets)     lane 1: giou-loss numerator
    #   lane 2: centerness BCE numerator    lane 3: focal positive correction
    lane = lax.broadcasted_iota(jnp.int32, (1, _LANES), 1)
    sums_ref[...] = jnp.where(lane == 0, ctr_sum,
                    jnp.where(lane == 1, giou_sum,
                    jnp.where(lane == 2, bce_sum,
                    jnp.where(lane == 3, corr_sum, 0.0))))


def pos_losses(pred_pos, tgt_pos, ctrp_pos, poscls_pos):
    # TODO(synk): at realistic tiny P this single launch is overhead-bound; it
    # could be folded into the focal pallas_call or left to XLA entirely.
    p = pred_pos.shape[0]
    p_pad = max(_LANES, _cdiv(p, _LANES) * _LANES)
    pad = p_pad - p
    pred_t = jnp.pad(pred_pos.T, ((0, 0), (0, pad)))                 # [4, Pp]
    tgt_t = jnp.pad(tgt_pos.T, ((0, 0), (0, pad)))                   # [4, Pp]
    ctrp_t = jnp.pad(ctrp_pos.reshape(1, -1), ((0, 0), (0, pad)))    # [1, Pp]
    poscls_t = jnp.pad(poscls_pos.reshape(1, -1), ((0, 0), (0, pad)))
    mask = jnp.pad(jnp.ones((1, p), jnp.float32), ((0, 0), (0, pad)))

    ctr_tgt, sums = pl.pallas_call(
        functools.partial(_pos_kernel, alpha=FOCAL_ALPHA),
        out_shape=(
            jax.ShapeDtypeStruct((1, p_pad), jnp.float32),
            jax.ShapeDtypeStruct((1, _LANES), jnp.float32),
        ),
    )(pred_t, tgt_t, ctrp_t, poscls_t, mask)
    return ctr_tgt[0, :p], sums[0, 0], sums[0, 1], sums[0, 2], sums[0, 3]


# ----------------------------------------------------------------------------
# FCOS2DLoss forward (glue in plain JAX, hot paths in Pallas).
# ----------------------------------------------------------------------------
def fcos2d_loss(logits_levels, box2d_levels, ctr_levels,
                labels, box2d_reg_targets, pos_inds):
    num_classes = logits_levels[0].shape[1]

    # NHWC-flatten + concat (same location ordering as the PyTorch module);
    # force_fp32 equivalent.  Classification logits are flattened all the way
    # to 1-D so the focal kernel gets a lane-dense [rows, 128] view with no
    # extra pad / one-hot / label-broadcast copies in XLA.
    # TODO(synk): a per-FPN-level NCHW kernel would avoid this relayout on
    # v5e, but it changes the pos_inds gather path, so it stays in XLA.
    cls_flat = jnp.concatenate(
        [jnp.transpose(x, (0, 2, 3, 1)).astype(jnp.float32).reshape(-1)
         for x in logits_levels])                                    # [N*C]
    box2d_reg_pred = jnp.concatenate(
        [jnp.transpose(x, (0, 2, 3, 1)).astype(jnp.float32).reshape(-1, 4)
         for x in box2d_levels], axis=0)                             # [N, 4]
    centerness_pred = jnp.concatenate(
        [jnp.transpose(x, (0, 2, 3, 1)).astype(jnp.float32).reshape(-1)
         for x in ctr_levels])                                       # [N]

    if labels.shape[0] != box2d_reg_targets.shape[0]:
        raise ValueError(
            "The size of 'labels' and 'box2d_reg_targets' does not match: "
            f"a={labels.shape[0]}, b={box2d_reg_targets.shape[0]}")

    num_pos = int(pos_inds.shape[0])
    num_pos_avg = max(float(num_pos), 1.0)   # single-process: world_size == 1

    # Negatives-only focal sum over all N*C logits (no one-hot / label slab).
    neg_sum = focal_neg_loss_sum(cls_flat)

    if num_pos == 0:
        zero = jnp.float32(0.0)
        return ({"loss_cls": neg_sum / num_pos_avg,
                 "loss_box2d_reg": zero,
                 "loss_centerness": zero}, {})

    # Data-dependent gathers stay in plain JAX (tiny: P elements each).
    # NOTE: assumes pos_inds are unique (standard FCOS targets).
    labels_pos = labels[pos_inds].astype(jnp.int32)
    poscls_pos = cls_flat[pos_inds * num_classes + labels_pos]   # GT-class logit
    pred_pos = box2d_reg_pred[pos_inds]
    tgt_pos = box2d_reg_targets[pos_inds].astype(jnp.float32)
    ctrp_pos = centerness_pred[pos_inds]

    ctr_tgt, ctr_sum, giou_sum, bce_sum, corr_sum = pos_losses(
        pred_pos, tgt_pos, ctrp_pos, poscls_pos)

    loss_cls = (neg_sum + corr_sum) / num_pos_avg
    loss_denom = jnp.maximum(ctr_sum, 1e-6)
    loss_box2d_reg = giou_sum / loss_denom
    loss_centerness = bce_sum / num_pos_avg

    loss_dict = {"loss_cls": loss_cls,
                 "loss_box2d_reg": loss_box2d_reg,
                 "loss_centerness": loss_centerness}
    extra_info = {"loss_denom": loss_denom, "centerness_targets": ctr_tgt}
    return loss_dict, extra_info


# ----------------------------------------------------------------------------
# Pure-JAX reference for verification.
# ----------------------------------------------------------------------------
def reference(logits_levels, box2d_levels, ctr_levels,
              labels, box2d_reg_targets, pos_inds):
    def flat(xs, c):
        return jnp.concatenate(
            [jnp.transpose(x, (0, 2, 3, 1)).reshape(-1, c) for x in xs], axis=0)

    logits = flat(logits_levels, NUM_CLASSES).astype(jnp.float32)
    box = flat(box2d_levels, 4).astype(jnp.float32)
    ctrp = flat(ctr_levels, 1).astype(jnp.float32).reshape(-1)
    num_pos_avg = max(float(pos_inds.shape[0]), 1.0)

    t = jnp.zeros_like(logits).at[pos_inds, labels[pos_inds]].set(1.0)
    x = logits
    p = jax.nn.sigmoid(x)
    ce = jnp.maximum(x, 0.0) - x * t + jnp.log1p(jnp.exp(-jnp.abs(x)))
    p_t = p * t + (1 - p) * (1 - t)
    a_t = FOCAL_ALPHA * t + (1 - FOCAL_ALPHA) * (1 - t)
    loss_cls = jnp.sum(a_t * ce * (1 - p_t) ** FOCAL_GAMMA) / num_pos_avg

    pred = box[pos_inds]
    tgt = box2d_reg_targets[pos_inds].astype(jnp.float32)
    cp = ctrp[pos_inds]
    lr = tgt[:, [0, 2]]
    tb = tgt[:, [1, 3]]
    ctr = jnp.sqrt(lr.min(-1) / lr.max(-1) * (tb.min(-1) / tb.max(-1)))
    loss_denom = jnp.maximum(jnp.sum(ctr), 1e-6)

    pl_, pt, pr, pb = pred[:, 0], pred[:, 1], pred[:, 2], pred[:, 3]
    tl, tt, tr, tb_ = tgt[:, 0], tgt[:, 1], tgt[:, 2], tgt[:, 3]
    t_area = (tl + tr) * (tt + tb_)
    p_area = (pl_ + pr) * (pt + pb)
    w_i = jnp.minimum(pl_, tl) + jnp.minimum(pr, tr)
    gw = jnp.maximum(pl_, tl) + jnp.maximum(pr, tr)
    h_i = jnp.minimum(pb, tb_) + jnp.minimum(pt, tt)
    gh = jnp.maximum(pb, tb_) + jnp.maximum(pt, tt)
    ac = gw * gh + 1e-7
    a_i = w_i * h_i
    a_u = t_area + p_area - a_i
    ious = (a_i + 1.0) / (a_u + 1.0)
    gious = ious - (ac - a_u) / ac
    loss_box = jnp.sum((1.0 - gious) * ctr) / loss_denom

    bce = jnp.maximum(cp, 0.0) - cp * ctr + jnp.log1p(jnp.exp(-jnp.abs(cp)))
    loss_ctr = jnp.sum(bce) / num_pos_avg
    return loss_cls, loss_box, loss_ctr


if __name__ == "__main__":
    key = jax.random.PRNGKey(0)
    B = 2
    spatials = [(16, 16), (8, 8)]   # two FPN levels

    keys = jax.random.split(key, 16)
    logits_levels, box2d_levels, ctr_levels = [], [], []
    ki = 0
    for (h, w) in spatials:
        logits_levels.append(jax.random.normal(
            keys[ki], (B, NUM_CLASSES, h, w), jnp.float32)); ki += 1
        box2d_levels.append(jax.nn.softplus(
            jax.random.normal(keys[ki], (B, 4, h, w), jnp.float32)) + 0.1); ki += 1
        ctr_levels.append(jax.random.normal(
            keys[ki], (B, 1, h, w), jnp.float32)); ki += 1

    N = sum(B * h * w for (h, w) in spatials)   # 640 locations
    labels = jax.random.randint(keys[ki], (N,), 0, NUM_CLASSES); ki += 1
    box2d_reg_targets = jax.random.uniform(keys[ki], (N, 4), jnp.float32, 0.1, 5.0); ki += 1
    P = 10
    pos_inds = jax.random.choice(keys[ki], N, (P,), replace=False); ki += 1

    loss_dict, extra = fcos2d_loss(logits_levels, box2d_levels, ctr_levels,
                                   labels, box2d_reg_targets, pos_inds)
    jax.block_until_ready(loss_dict)

    ref_cls, ref_box, ref_ctr = reference(logits_levels, box2d_levels, ctr_levels,
                                          labels, box2d_reg_targets, pos_inds)
    np.testing.assert_allclose(np.asarray(loss_dict["loss_cls"]),
                               np.asarray(ref_cls), rtol=3e-4, atol=1e-4)
    np.testing.assert_allclose(np.asarray(loss_dict["loss_box2d_reg"]),
                               np.asarray(ref_box), rtol=1e-4, atol=1e-5)
    np.testing.assert_allclose(np.asarray(loss_dict["loss_centerness"]),
                               np.asarray(ref_ctr), rtol=1e-4, atol=1e-5)

    # Also exercise the ragged-tail (in-kernel masked) path of the focal kernel.
    x_ragged = jax.random.normal(keys[ki], (5000,), jnp.float32); ki += 1
    got = focal_neg_loss_sum(x_ragged)
    want = jnp.sum((1.0 - FOCAL_ALPHA) * jax.nn.softplus(x_ragged)
                   * jax.nn.sigmoid(x_ragged) ** 2)
    jax.block_until_ready(got)
    np.testing.assert_allclose(np.asarray(got), np.asarray(want),
                               rtol=3e-4, atol=1e-4)

    print("KERNEL_OK")
</pallas_src>

<mosaic_0001>
module attributes {stable_mosaic.version = 11 : i64} {
  func.func @_focal_neg_kernel(%arg0: i32, %arg1: memref<8x128xf32, #tpu.memory_space<vmem>>, %arg2: memref<8x128xf32, #tpu.memory_space<vmem>>) attributes {dimension_semantics = [#tpu.dimension_semantics<parallel>], iteration_bounds = array<i64: 5>, scalar_prefetch = 0 : i64, scratch_operands = 0 : i64, tpu.core_type = #tpu.core_type<tc>, window_params = [{transform_indices = @transform_0, window_bounds = array<i64: 8, 128>}, {transform_indices = @transform_1, window_bounds = array<i64: 8, 128>}]} {
    %c0 = arith.constant 0 : index
    %c0_0 = arith.constant 0 : index
    %0 = vector.load %arg1[%c0, %c0_0] : memref<8x128xf32, #tpu.memory_space<vmem>>, vector<8x128xf32>
    %1 = math.absf %0 : vector<8x128xf32>
    %cst = arith.constant 0.000000e+00 : f32
    %2 = vector.broadcast %cst : f32 to vector<8x128xf32>
    %3 = arith.subf %2, %1 : vector<8x128xf32>
    %4 = math.exp %3 : vector<8x128xf32>
    %cst_1 = arith.constant 0.000000e+00 : f32
    %5 = vector.broadcast %cst_1 : f32 to vector<8x128xf32>
    %6 = arith.maximumf %0, %5 : vector<8x128xf32>
    %cst_2 = arith.constant 1.000000e+00 : f32
    %7 = vector.broadcast %cst_2 : f32 to vector<8x128xf32>
    %8 = arith.addf %7, %4 : vector<8x128xf32>
    %9 = math.log %8 : vector<8x128xf32>
    %10 = arith.addf %6, %9 : vector<8x128xf32>
    %11 = arith.subf %0, %10 : vector<8x128xf32>
    %cst_3 = arith.constant 2.000000e+00 : f32
    %12 = vector.broadcast %cst_3 : f32 to vector<8x128xf32>
    %13 = arith.mulf %12, %11 : vector<8x128xf32>
    %14 = math.exp %13 : vector<8x128xf32>
    %cst_4 = arith.constant 7.500000e-01 : f32
    %15 = vector.broadcast %cst_4 : f32 to vector<8x128xf32>
    %16 = arith.mulf %15, %10 : vector<8x128xf32>
    %17 = arith.mulf %16, %14 : vector<8x128xf32>
    %18 = vector.shape_cast %17 : vector<8x128xf32> to vector<1x8x128xf32>
    %cst_5 = arith.constant dense<0.000000e+00> : vector<8x128xf32>
    %19 = vector.multi_reduction <add>, %18, %cst_5 [0] : vector<1x8x128xf32> to vector<8x128xf32>
    %c0_6 = arith.constant 0 : index
    %c0_7 = arith.constant 0 : index
    %20 = vector.load %arg2[%c0_6, %c0_7] : memref<8x128xf32, #tpu.memory_space<vmem>>, vector<8x128xf32>
    tpu.vector_store %arg2[%c0_6, %c0_7], %19 {strides = array<i32>} : memref<8x128xf32, #tpu.memory_space<vmem>>, vector<8x128xf32>,
    return
  }
  func.func @transform_0(%arg0: i32) -> (i32, i32) {
    %c0_i32 = arith.constant 0 : i32
    %c0_i32_0 = arith.constant 0 : i32
    return %arg0, %c0_i32 : i32, i32
  }
  func.func @transform_1(%arg0: i32) -> (i32, i32) {
    %c0_i32 = arith.constant 0 : i32
    %c0_i32_0 = arith.constant 0 : i32
    return %arg0, %c0_i32 : i32, i32
  }
}

</mosaic_0001>

<bundles_post_ra>
// kernel: tpu_custom_call.1
= control target key start
LH: loop header
LB: loop body
LE: loop exit
PB: predicated region body
PF: predicated region fallthrough
CT: control target
= control target key end

     0   :  { %6 = vsyncpa [#allocation3], 0  ;;  %s567_s0 = inlined_call_operand.hbm [shape: f32[40,128], index: 0, kind: input, shape index: {}]   ;;  %s568_s1 = inlined_call_operand.hbm [shape: f32[40,128], index: 1, kind: output, shape index: {}]  }
   0x1   :  { %8 = vsyncpa [#allocation3 + $0x1], 0 }
   0x2   :  { %9 = vsyncpa [#allocation4], 0 }
   0x3   :  { %11 = vsyncpa [#allocation4 + $0x1], 0  ;;  %s408_s6 = smov 0   ;;  %s410_s7 = smov 0  }
   0x4   :  { %s412_s8 = smov 0   ;;  %s414_s9 = smov 0  }
   0x5 LB: > { %s429_s10 = sadd.s32 4294967295, %s394_s9   ;;  %s234_s11 = sadd.s32 4294967294, %s394_s9   ;;  %s394_s9 = sphi %s414_s9, %s582_s9   ;;  %s390_s8 = sphi %s412_s8, %s581_s8   ;;  %s386_s7 = sphi %s410_s7, %s580_s7   ;;  %s382_s6 = sphi %s408_s6, %s579_s6  }
   0x6   : > { %s433_s12 = sadd.s32 1, %s394_s9   ;;  %s24_s13 = sadd.s32 1, %s390_s8 }
   0x7   : > { %s21_s14 = ssub.s32 %s394_s9, %s433_s12  ;;  %p31_p0 = scmp.ne.s32.totalorder %s390_s8, %s386_s7 }
   0x8   : > { %p22_p1 = scmp.eq.s32.totalorder %s21_s14, 0  ;;  %p32_p2 = scmp.eq.s32.totalorder %s394_s9, 0 }
   0x9   : > { %p37_p3 = scmp.ne.s32.totalorder %s386_s7, %s382_s6  ;;  %p38_p4 = scmp.eq.s32.totalorder %s429_s10, 0 }
   0xa   : > { %s445_s15 = scalar_select %p22_p1, %s390_s8, %s24_s13  }
   0xb   : > { %p447_p5 = por %p32_p2, %p31_p0  ;;  %p451_p6 = por %p38_p4, %p37_p3 }
   0xc   : > { %p61_p7 = scmp.eq.s32.totalorder %s429_s10, 4  ;;  %p67_p8 = scmp.eq.s32.totalorder %s234_s11, 4 }
   0xd   : > { %p258_p9 = scmp.lt.s32.totalorder %s394_s9, 5  ;;  %s87_s20 = sand.u32 1, %s390_s8  }
   0xe   : > { %p457_p10 = por %p61_p7, %p31_p0  ;;  %p461_p11 = por %p67_p8, %p37_p3 }
   0xf   : > { %s238_s21 = sshll.u32 %s394_s9, 7  ;;  %s237_s22 = sshll.u32 %s87_s20, 3 }
  0x10   : > { %s572_s18 = scalar_select %p457_p10, 1, 0 }
  0x11   : > { %s573_s19 = scalar_select %p461_p11, 1, 0 }
  0x12   : > { %s470_s25 = scalar_lea.hbm %s567_s0, %s238_s21  ;;  %s91_s26 = scalar_lea.vmem [#allocation2], %s237_s22 }
  0x13   : > { %s98_s27 = sshll.u32 %s91_s26, 4  ;;  %p474_p12 = pnand %p258_p9, %p447_p5  ;;  %s478_s27 = int_to_ptr.vmem [resolvable:$true] %s98_s27 }
  0x14   : > { %s88_s29 = scalar_lea.sflag [#allocation3], %s87_s20  ;;  %s298_s30 = scalar_lea.hbm %s470_s25, 128 }
  0x15   : > { %p299_p1 = scmp.ne.s32.totalorder %s470_s25, %s298_s30  ;;  %p300_p2 = pneg %p474_p12 }
  0x16   : > { %s303_s4 = scalar_lea.hbm %s567_s0, 640  ;;  %p304_p5 = scmp.lt.u32.totalorder %s470_s25, %s567_s0 }
  0x17   : > { %p301_p3 = pnand %p300_p2, %p299_p1  ;;  %p305_p7 = scmp.lt.u32.totalorder %s303_s4, %s298_s30 }
  0x18   : > { %p307_p9 = scmp.lt.u32.totalorder %s298_s30, %s470_s25 }
  0x19   : > { %p302_p4 = pneg %p301_p3  ;;  %p306_p8 = por %p305_p7, %p304_p5 }
  0x1b   : > { %p308_p13 = por %p307_p9, %p306_p8 }
  0x1d   : > { %p309_p0 = pnand %p308_p13, %p302_p4 }
  0x1f   : > { %312 = shalt.err (!%p309_p0)
}
  0x20   : > { %s313_s13 = scalar_lea.vmem %s478_s27, 128  ;;  %s396_s14 = smov [#allocation2]  }
  0x21   : > { %p314_p1 = scmp.ne.s32.totalorder %s478_s27, %s313_s13  ;;  %s318_s16 = sshll.u32 %s396_s14, 4  ;;  %s319_s16 = int_to_ptr.vmem [resolvable:$false] %s318_s16 }
  0x22   : > { %s320_s20 = scalar_lea.vmem %s319_s16, 256  ;;  %p321_p10 = scmp.lt.s32.totalorder %s478_s27, %s319_s16 }
  0x23   : > { %p316_p3 = pnand %p314_p1, %p300_p2  ;;  %p322_p5 = scmp.lt.s32.totalorder %s320_s20, %s313_s13 }
  0x25   : > { %p317_p11 = pneg %p316_p3  ;;  %p323_p7 = por %p322_p5, %p321_p10 }
  0x27   : > { %p324_p8 = pnand %p323_p7, %p317_p11 }
  0x29   : > { %327 = shalt.err (!%p324_p8)
}
  0x2a   : > { %253 = dma.hbm_to_vmem [thread:$0]  (!%p474_p12), %s470_s25, 128, %s478_s27, %s88_s29  }
  0x2b   : > { %p575_p13 = scmp.lt.s32.totalorder %s394_s9, 6  ;;  %p576_p0 = scmp.ge.s32.totalorder %s394_s9, 1 }
  0x2d   : > { %p104_p2 = pnand %p576_p0, %p575_p13 }
  0x2e   : > { %s512_s21 = sand.u32 (!%p104_p2), 1, %s386_s7  }
  0x2f   : > { %107 = sbr.rel (%p104_p2) target bundleno = 123 (0x7b), region = 24  ;;  %s240_s22 = sshll.u32 (!%p104_p2), %s512_s21, 3 }
  0x30   : > { %s110_s23 = scalar_lea.sflag (!%p104_p2), [#allocation3], %s512_s21  ;;  %s113_s24 = scalar_lea.vmem (!%p104_p2), [#allocation2], %s240_s22 }
  0x36   : > { %373 = dma.done.wait (%p451_p6), %s110_s23, 128  }
  0x37   : > { %375 = vsyncadd (%p451_p6), %s110_s23, 4294967168  ;;  %v132_v0 = vld [vmem:[%s113_s24] sm:$0xff]  ;;  %s131_s17 = scalar_lea.vmem [#allocation5], %s240_s22  ;;  %s243_s26 = sshll.u32 %s429_s10, 7 }
  0x38   : > { %v133_v1 = vand.u32 2147483647, %v132_v0  ;;  %v137_v6 = vmax.f32 %v132_v0, 0.0  ;;  %s164_s25 = sshll.u32 %s131_s17, 4  ;;  %s526_s29 = scalar_lea.hbm %s568_s1, %s243_s26  ;;  %s521_s25 = int_to_ptr.vmem [resolvable:$true] %s164_s25 }
  0x39   : > { %s151_s30 = scalar_lea.sflag [#allocation4], %s512_s21  ;;  %s328_s2 = scalar_lea.vmem %s521_s25, 128 }
  0x3a   : > { %v134_v2 = vsub.f32 0.0, %v133_v1  ;;  %p329_p6 = scmp.ne.s32.totalorder %s521_s25, %s328_s2  ;;  %p577_p10 = scmp.ne.s32.totalorder %s572_s18, 0 }
  0x3b   : > { %s397_s10 = smov [#allocation5]  }
  0x3c   : > { %v135_v3 = vmul.f32 1.442695, %v134_v2  ;;  %p330_p11 = pnand %p329_p6, %p577_p10  ;;  %s332_s3 = sshll.u32 %s397_s10, 4  ;;  %s333_s3 = int_to_ptr.vmem [resolvable:$false] %s332_s3 }
  0x3d   : > { %s334_s4 = scalar_lea.vmem %s333_s3, 256  ;;  %p335_p4 = scmp.lt.s32.totalorder %s521_s25, %s333_s3 }
  0x3e   : > { %292 = vpow2.f32 %v135_v3  ;;  %p331_p12 = pneg %p330_p11  ;;  %p336_p9 = scmp.lt.s32.totalorder %s334_s4, %s328_s2 }
  0x40   : > { %p337_p1 = por %p336_p9, %p335_p4 }
  0x42   : > { %p338_p3 = pnand %p337_p1, %p331_p12 }
  0x48   : > { %v293_v4 = vpop.eup %292 }
  0x49   : > { %v138_v5 = vadd.f32 1.0, %v293_v4 }
  0x4b   : > { %294 = vlog2.f32 %v138_v5 }
  0x55   : > { %v295_v7 = vpop.eup %294 }
  0x56   : > { %v140_v8 = vmul.f32 0.6931472, %v295_v7 }
  0x58   : > { %v141_v9 = vadd.f32 %v140_v8, %v137_v6 }
  0x5a   : > { %v142_v10 = vsub.f32 %v132_v0, %v141_v9  ;;  %v146_v13 = vmul.f32 0.75, %v141_v9 }
  0x5c   : > { %v143_v11 = vmul.f32 2.0, %v142_v10 }
  0x5e   : > { %v144_v12 = vmul.f32 1.442695, %v143_v11 }
  0x60   : > { %296 = vpow2.f32 %v144_v12 }
  0x6a   : > { %v297_v14 = vpop.eup %296 }
  0x6b   : > { %v147_v15 = vmul.f32 %v297_v14, %v146_v13 }
  0x6d   : > { %149 = vst [vmem:[%s131_s17] sm:$0xff] %v147_v15 }
  0x6e   : > { %341 = shalt.err (!%p338_p3)
}
  0x6f   : > { %s342_s5 = scalar_lea.hbm %s526_s29, 128  ;;  %s346_s14 = scalar_lea.hbm %s568_s1, 640 }
  0x70   : > { %p343_p5 = scmp.ne.s32.totalorder %s526_s29, %s342_s5  ;;  %p347_p13 = scmp.lt.u32.totalorder %s526_s29, %s568_s1 }
  0x71   : > { %p348_p0 = scmp.lt.u32.totalorder %s346_s14, %s342_s5  ;;  %p350_p6 = scmp.lt.u32.totalorder %s342_s5, %s526_s29 }
  0x72   : > { %p344_p7 = pnand %p343_p5, %p577_p10 }
  0x73   : > { %p349_p2 = por %p348_p0, %p347_p13 }
  0x74   : > { %p345_p8 = pneg %p344_p7 }
  0x75   : > { %p351_p11 = por %p350_p6, %p349_p2 }
  0x77   : > { %p352_p12 = pnand %p351_p11, %p345_p8 }
  0x79   : > { %355 = shalt.err (!%p352_p12)
}
  0x7a   : > { %248 = dma.vmem_to_hbm [thread:$0]  (%p577_p10), %s521_s25, 128, %s526_s29, %s151_s30  }
  0x7b PF: > { %p259_p4 = scmp.ge.s32.totalorder %s394_s9, 2  ;;  %s176_s21 = sand.u32 1, %s382_s6  }
  0x7c   : > { %p578_p9 = scmp.ne.s32.totalorder %s573_s19, 0  ;;  %s177_s22 = scalar_lea.sflag [#allocation4], %s176_s21 }
  0x7e   : > { %p255_p1 = pnand %p259_p4, %p578_p9 }
  0x80   : > { %377 = dma.done.wait (!%p255_p1), %s177_s22, 128  }
  0x81   : > { %379 = vsyncadd (!%p255_p1), %s177_s22, 4294967168  ;;  %p14_p3 = scmp.ge.s32.totalorder %s433_s12, 7   ;;  %s579_s6 = smov %s386_s7 }
  0x82   : > { %s580_s7 = smov %s390_s8  ;;  %s581_s8 = smov %s445_s15 }
  0x83   : > { %s582_s9 = smov %s433_s12  ;;  %16 = sbr.rel (!%p14_p3) target bundleno = 5 (0x5), region = 69 }
  0x8a   :  { %182 = vsyncpa [#allocation3], 1 }
  0x8b   :  { %184 = vsyncpa [#allocation3 + $0x1], 1 }
  0x8c   :  { %185 = vsyncpa [#allocation4], 1 }
  0x8d   :  { %187 = vsyncpa [#allocation4 + $0x1], 1 }

</bundles_post_ra>
